<compile_context>
chip_gen: v7x
topology: tpu7x:2x2x1
jax: 0.10.0
libtpu: 0.0.40
codegen_flags: <defaults>
</compile_context>

<pallas_src>
import functools

import jax
import jax.numpy as jnp
from jax.experimental import pallas as pl
from jax.experimental.pallas import tpu as pltpu

LANES = 128
SUBLANES = 8
CHUNK_ROWS = 512        # in-kernel accumulation sub-chunk (256 KiB f32)
MAX_TILE_ROWS = 4096    # 4096 x 128 x f32 = 2 MiB per stream per buffer


def _cdiv(a, b):
    return -(-a // b)


def _tensorcores_per_chip():
    """2 on megacore chips (v4 / v5p / v7x), else 1.  Purely a perf hint."""
    try:
        kind = jax.devices()[0].device_kind.lower()
    except Exception:
        return 1
    if ("v4" in kind) or ("v5p" in kind) or ("7" in kind):
        return 2
    return 1


def _make_bce_kernel(*, weighted, binary_fast, rows_valid, tile_rows,
                     chunk_rows, steps, need_mask):
    """Build a BCE partial-sum kernel with all static geometry baked in."""
    nchunks = tile_rows // chunk_rows

    def _body(p_ref, t_ref, w_ref, o_ref, acc_ref):
        c = pl.program_id(0)
        i = pl.program_id(1)

        @pl.when(i == 0)
        def _():
            acc_ref[...] = jnp.zeros_like(acc_ref)

        # Logical global row offset of this block (NOT the clamped DMA index).
        row0 = (c * steps + i) * tile_rows

        def chunk(ci, carry):
            r = ci * chunk_rows
            p = p_ref[pl.ds(r, chunk_rows), :].astype(jnp.float32)
            t = t_ref[pl.ds(r, chunk_rows), :].astype(jnp.float32)
            if binary_fast:
                # One transcendental per element (exact for hard 0/1 targets).
                x = jnp.where(t > 0.5, p, 1.0 - p)
                nll = -jnp.maximum(jnp.log(x), -100.0)
            else:
                log_p = jnp.maximum(jnp.log(p), -100.0)      # clamp BEFORE blend
                log_1mp = jnp.maximum(jnp.log1p(-p), -100.0)
                nll = -(log_1mp + t * (log_p - log_1mp))
            if weighted:
                nll = nll * w_ref[pl.ds(r, chunk_rows), :].astype(jnp.float32)
            if need_mask:
                # Last logical block may be partial (or fully OOB when the
                # 2-core grid over-covers): OOB rows hold garbage -> select 0.
                ridx = jax.lax.broadcasted_iota(jnp.int32, (chunk_rows, LANES), 0)
                nll = jnp.where(ridx + (row0 + r) < rows_valid, nll, 0.0)
            # Fold onto the (8,128) vreg-shaped accumulator (pure VPU adds).
            if chunk_rows % SUBLANES == 0:
                acc_ref[...] += nll.reshape(chunk_rows // SUBLANES, SUBLANES,
                                            LANES).sum(axis=0)
            else:
                # Tiny unaligned single-block case: cross-sublane reduce (XLU).
                acc_ref[0:1, :] += jnp.sum(nll, axis=0, keepdims=True)
            return carry

        if nchunks == 1:
            chunk(0, 0)
        else:
            jax.lax.fori_loop(0, nchunks, chunk, 0, unroll=True)

        @pl.when(i == pl.num_programs(1) - 1)
        def _():
            o_ref[...] = acc_ref[...]

    if weighted:
        def kernel(p_ref, t_ref, w_ref, o_ref, acc_ref):
            _body(p_ref, t_ref, w_ref, o_ref, acc_ref)
    else:
        def kernel(p_ref, t_ref, o_ref, acc_ref):
            _body(p_ref, t_ref, None, o_ref, acc_ref)
    return kernel


@functools.partial(jax.jit, static_argnames=("binary_targets",))
def acumen_binary_cross_entropy(y_true, y_pred_probs, weights=None,
                                binary_targets=False):
    """Mean BCE over all flattened elements == F.binary_cross_entropy."""
    p = jnp.ravel(y_pred_probs)       # free reshape, native dtype preserved
    t = jnp.ravel(y_true)
    n = p.shape[0]

    # weights: None | scalar (post-scale, never streamed) | per-element stream.
    scale = None
    w = None
    if weights is not None:
        w_flat = jnp.ravel(jnp.asarray(weights))
        if w_flat.size == 1:
            scale = w_flat[0].astype(jnp.float32)   # mean(w*x) == w*mean(x)
        elif w_flat.size == n:
            w = w_flat
        else:
            raise ValueError("weights must broadcast against the flattened input")
    weighted = w is not None
    streams = [p, t] + ([w] if weighted else [])

    # 2-D (rows, 128) view; pad ONLY if n is not a multiple of 128 (uncommon),
    # and then only to the next multiple of 128 (zero elements contribute 0).
    rows = _cdiv(n, LANES)
    if n % LANES:
        streams = [jnp.pad(x, (0, rows * LANES - n)) for x in streams]
    streams = [x.reshape(rows, LANES) for x in streams]

    # Static tile geometry (shapes are static under jit).
    if rows >= MAX_TILE_ROWS:
        tile_rows = MAX_TILE_ROWS          # multi-block, chunked accumulation
        chunk_rows = CHUNK_ROWS
    else:
        tile_rows = rows                   # single full-extent block
        chunk_rows = CHUNK_ROWS if (rows % CHUNK_ROWS == 0 and rows > 0) else rows
    nblocks = _cdiv(rows, tile_rows)
    ncores = 2 if (nblocks >= 2 and _tensorcores_per_chip() == 2) else 1
    steps = _cdiv(nblocks, ncores)
    need_mask = (ncores * steps * tile_rows) != rows

    kernel = _make_bce_kernel(weighted=weighted, binary_fast=binary_targets,
                              rows_valid=rows, tile_rows=tile_rows,
                              chunk_rows=chunk_rows, steps=steps,
                              need_mask=need_mask)

    # Over-covering grid steps re-read the last valid block (then mask it out).
    in_block = pl.BlockSpec(
        (tile_rows, LANES),
        lambda c, i: (jnp.minimum(c * steps + i, nblocks - 1), 0))
    out_block = pl.BlockSpec((SUBLANES, LANES), lambda c, i: (c, 0))

    partials = pl.pallas_call(
        kernel,
        out_shape=jax.ShapeDtypeStruct((ncores * SUBLANES, LANES), jnp.float32),
        grid_spec=pltpu.PrefetchScalarGridSpec(
            num_scalar_prefetch=0,
            grid=(ncores, steps),
            in_specs=[in_block] * len(streams),
            out_specs=out_block,
            scratch_shapes=[pltpu.VMEM((SUBLANES, LANES), jnp.float32)],
        ),
        compiler_params=pltpu.CompilerParams(
            dimension_semantics=("parallel", "arbitrary"),
            vmem_limit_bytes=32 * 1024 * 1024,
        ),
    )(*streams)

    # Tiny cross-lane reduce + divide-by-N stays as plain-JAX glue.
    loss = jnp.sum(partials) / jnp.float32(n)
    if scale is not None:
        loss = loss * scale
    return loss


def _reference_bce(y_true, y_pred_probs, weights=None):
    p = jnp.ravel(y_pred_probs).astype(jnp.float32)
    t = jnp.ravel(y_true).astype(jnp.float32)
    log_p = jnp.maximum(jnp.log(p), -100.0)
    log_1mp = jnp.maximum(jnp.log1p(-p), -100.0)
    nll = -(t * log_p + (1.0 - t) * log_1mp)
    if weights is not None:
        w = jnp.ravel(jnp.asarray(weights)).astype(jnp.float32)
        nll = nll * jnp.broadcast_to(w, nll.shape)
    return jnp.mean(nll)


if __name__ == "__main__":
    key = jax.random.PRNGKey(0)
    k1, k2, k3, k4, k5, k6, k7 = jax.random.split(key, 7)

    # Small NCHW-style probability tensor and 0/1 targets (forward flattens).
    shape = (2, 4, 16, 16)  # 2048 elements, lane-aligned -> copy-free path
    y_pred_probs = jax.nn.sigmoid(jax.random.normal(k1, shape, dtype=jnp.float32))
    y_true = (jax.random.uniform(k2, shape) > 0.5).astype(jnp.float32)

    # 1) Unweighted (module default).
    out = jax.block_until_ready(acumen_binary_cross_entropy(y_true, y_pred_probs))
    ref = _reference_bce(y_true, y_pred_probs)
    assert jnp.allclose(out, ref, rtol=1e-4, atol=1e-6), (out, ref)

    # 2) Per-element weights (streamed, 3 input streams).
    n_elems = 2 * 4 * 16 * 16
    weights = 0.5 + 0.5 * jnp.arange(n_elems, dtype=jnp.float32) / n_elems
    out_w = jax.block_until_ready(
        acumen_binary_cross_entropy(y_true, y_pred_probs, weights))
    ref_w = _reference_bce(y_true, y_pred_probs, weights)
    assert jnp.allclose(out_w, ref_w, rtol=1e-4, atol=1e-6), (out_w, ref_w)

    # 3) Scalar weight: never streamed, scales the final mean instead.
    out_s = jax.block_until_ready(
        acumen_binary_cross_entropy(y_true, y_pred_probs, jnp.float32(0.37)))
    ref_s = _reference_bce(y_true, y_pred_probs, jnp.float32(0.37))
    assert jnp.allclose(out_s, ref_s, rtol=1e-4, atol=1e-6), (out_s, ref_s)

    # 4) Binary-target fast path (one log per element).
    out_b = jax.block_until_ready(
        acumen_binary_cross_entropy(y_true, y_pred_probs, binary_targets=True))
    assert jnp.allclose(out_b, ref, rtol=1e-4, atol=1e-6), (out_b, ref)

    # 5) Native bf16 streaming (casts happen in-kernel on the VPU).
    out_h = jax.block_until_ready(acumen_binary_cross_entropy(
        y_true.astype(jnp.bfloat16), y_pred_probs.astype(jnp.bfloat16)))
    ref_h = _reference_bce(y_true.astype(jnp.bfloat16),
                           y_pred_probs.astype(jnp.bfloat16))
    assert jnp.allclose(out_h, ref_h, rtol=1e-4, atol=1e-6), (out_h, ref_h)

    # 6) Non-lane-aligned size: exercises the minimal 128-pad + XLU row fold.
    shape2 = (3, 555, 97)  # 161,505 elements
    p2 = jax.nn.sigmoid(jax.random.normal(k3, shape2, dtype=jnp.float32))
    t2 = (jax.random.uniform(k4, shape2) > 0.5).astype(jnp.float32)
    out2 = jax.block_until_ready(acumen_binary_cross_entropy(t2, p2))
    ref2 = _reference_bce(t2, p2)
    assert jnp.allclose(out2, ref2, rtol=1e-4, atol=1e-6), (out2, ref2)

    # 7) Multi-block weighted case: 4096-row tiles, chunked accumulation,
    #    in-kernel ragged-row masking, and the 2-core split on megacore chips.
    shape3 = (130, 8192)  # 1,064,960 elements -> 3 tiles of 4096 rows
    p3 = jax.nn.sigmoid(jax.random.normal(k5, shape3, dtype=jnp.float32))
    t3 = (jax.random.uniform(k6, shape3) > 0.5).astype(jnp.float32)
    w3 = jax.random.uniform(k7, (130 * 8192,), dtype=jnp.float32) + 0.25
    out3 = jax.block_until_ready(acumen_binary_cross_entropy(t3, p3, w3))
    ref3 = _reference_bce(t3, p3, w3)
    assert jnp.allclose(out3, ref3, rtol=1e-4, atol=1e-6), (out3, ref3)

    print("KERNEL_OK")
</pallas_src>

<mosaic_0001>
module attributes {stable_mosaic.version = 11 : i64} {
  func.func @kernel(%arg0: i32, %arg1: i32, %arg2: memref<16x128xf32, #tpu.memory_space<vmem>>, %arg3: memref<16x128xf32, #tpu.memory_space<vmem>>, %arg4: memref<8x128xf32, #tpu.memory_space<vmem>>, %arg5: memref<8x128xf32, #tpu.memory_space<vmem>>) attributes {dimension_semantics = [#tpu.dimension_semantics<parallel>, #tpu.dimension_semantics<arbitrary>], iteration_bounds = array<i64: 1, 1>, scalar_prefetch = 0 : i64, scratch_operands = 1 : i64, tpu.core_type = #tpu.core_type<tc>, window_params = [{transform_indices = @transform_0, window_bounds = array<i64: 16, 128>}, {transform_indices = @transform_1, window_bounds = array<i64: 16, 128>}, {transform_indices = @transform_2, window_bounds = array<i64: 8, 128>}]} {
    %c0_i32 = arith.constant 0 : i32
    %0 = arith.cmpi eq, %arg1, %c0_i32 : i32
    %1 = arith.extui %0 : i1 to i32
    %c0_i32_0 = arith.constant 0 : i32
    %2 = arith.cmpi ne, %1, %c0_i32_0 : i32
    scf.if %2 {
      %cst_14 = arith.constant 0.000000e+00 : f32
      %26 = vector.broadcast %cst_14 : f32 to vector<8x128xf32>
      %c0_15 = arith.constant 0 : index
      %c0_16 = arith.constant 0 : index
      %27 = vector.load %arg5[%c0_15, %c0_16] : memref<8x128xf32, #tpu.memory_space<vmem>>, vector<8x128xf32>
      tpu.vector_store %arg5[%c0_15, %c0_16], %26 {strides = array<i32>} : memref<8x128xf32, #tpu.memory_space<vmem>>, vector<8x128xf32>,
    } else {
    }
    %c0 = arith.constant 0 : index
    %c0_1 = arith.constant 0 : index
    %3 = vector.load %arg2[%c0, %c0_1] : memref<16x128xf32, #tpu.memory_space<vmem>>, vector<16x128xf32>
    %c0_2 = arith.constant 0 : index
    %c0_3 = arith.constant 0 : index
    %4 = vector.load %arg3[%c0_2, %c0_3] : memref<16x128xf32, #tpu.memory_space<vmem>>, vector<16x128xf32>
    %5 = math.log %3 : vector<16x128xf32>
    %cst = arith.constant -1.000000e+02 : f32
    %6 = vector.broadcast %cst : f32 to vector<16x128xf32>
    %7 = arith.maximumf %5, %6 : vector<16x128xf32>
    %cst_4 = arith.constant 0.000000e+00 : f32
    %8 = vector.broadcast %cst_4 : f32 to vector<16x128xf32>
    %9 = arith.subf %8, %3 : vector<16x128xf32>
    %10 = math.log1p %9 : vector<16x128xf32>
    %cst_5 = arith.constant -1.000000e+02 : f32
    %11 = vector.broadcast %cst_5 : f32 to vector<16x128xf32>
    %12 = arith.maximumf %10, %11 : vector<16x128xf32>
    %13 = arith.subf %7, %12 : vector<16x128xf32>
    %14 = arith.mulf %4, %13 : vector<16x128xf32>
    %15 = arith.addf %12, %14 : vector<16x128xf32>
    %cst_6 = arith.constant 0.000000e+00 : f32
    %16 = vector.broadcast %cst_6 : f32 to vector<16x128xf32>
    %17 = arith.subf %16, %15 : vector<16x128xf32>
    %c0_7 = arith.constant 0 : index
    %c0_8 = arith.constant 0 : index
    %18 = vector.load %arg5[%c0_7, %c0_8] : memref<8x128xf32, #tpu.memory_space<vmem>>, vector<8x128xf32>
    %19 = vector.shape_cast %17 : vector<16x128xf32> to vector<2x8x128xf32>
    %cst_9 = arith.constant dense<0.000000e+00> : vector<8x128xf32>
    %20 = vector.multi_reduction <add>, %19, %cst_9 [0] : vector<2x8x128xf32> to vector<8x128xf32>
    %21 = arith.addf %18, %20 : vector<8x128xf32>
    %c0_10 = arith.constant 0 : index
    %c0_11 = arith.constant 0 : index
    %22 = vector.load %arg5[%c0_10, %c0_11] : memref<8x128xf32, #tpu.memory_space<vmem>>, vector<8x128xf32>
    tpu.vector_store %arg5[%c0_10, %c0_11], %21 {strides = array<i32>} : memref<8x128xf32, #tpu.memory_space<vmem>>, vector<8x128xf32>,
    %c0_i32_12 = arith.constant 0 : i32
    %23 = arith.cmpi eq, %arg1, %c0_i32_12 : i32
    %24 = arith.extui %23 : i1 to i32
    %c0_i32_13 = arith.constant 0 : i32
    %25 = arith.cmpi ne, %24, %c0_i32_13 : i32
    scf.if %25 {
      %c0_14 = arith.constant 0 : index
      %c0_15 = arith.constant 0 : index
      %26 = vector.load %arg5[%c0_14, %c0_15] : memref<8x128xf32, #tpu.memory_space<vmem>>, vector<8x128xf32>
      %c0_16 = arith.constant 0 : index
      %c0_17 = arith.constant 0 : index
      %27 = vector.load %arg4[%c0_16, %c0_17] : memref<8x128xf32, #tpu.memory_space<vmem>>, vector<8x128xf32>
      tpu.vector_store %arg4[%c0_16, %c0_17], %26 {strides = array<i32>} : memref<8x128xf32, #tpu.memory_space<vmem>>, vector<8x128xf32>,
    } else {
    }
    return
  }
  func.func @transform_0(%arg0: i32, %arg1: i32) -> (i32, i32) {
    %c1_i32 = arith.constant 1 : i32
    %0 = arith.muli %arg0, %c1_i32 : i32
    %1 = arith.addi %0, %arg1 : i32
    %c0_i32 = arith.constant 0 : i32
    %2 = arith.minsi %1, %c0_i32 : i32
    %c0_i32_0 = arith.constant 0 : i32
    %c0_i32_1 = arith.constant 0 : i32
    return %2, %c0_i32_0 : i32, i32
  }
  func.func @transform_1(%arg0: i32, %arg1: i32) -> (i32, i32) {
    %c1_i32 = arith.constant 1 : i32
    %0 = arith.muli %arg0, %c1_i32 : i32
    %1 = arith.addi %0, %arg1 : i32
    %c0_i32 = arith.constant 0 : i32
    %2 = arith.minsi %1, %c0_i32 : i32
    %c0_i32_0 = arith.constant 0 : i32
    %c0_i32_1 = arith.constant 0 : i32
    return %2, %c0_i32_0 : i32, i32
  }
  func.func @transform_2(%arg0: i32, %arg1: i32) -> (i32, i32) {
    %c0_i32 = arith.constant 0 : i32
    %c0_i32_0 = arith.constant 0 : i32
    return %arg0, %c0_i32 : i32, i32
  }
}

</mosaic_0001>

<bundles_post_ra>
// kernel: acumen_binary_cross_entropy.1
= control target key start
LH: loop header
LB: loop body
LE: loop exit
PB: predicated region body
PF: predicated region fallthrough
CT: control target
= control target key end

     0   :  { %s183_s0 = inlined_call_operand.vmem [shape: f32[16,128], index: 0, kind: input, shape index: {}]   ;;  %s184_s1 = inlined_call_operand.vmem [shape: f32[16,128], index: 1, kind: input, shape index: {}]   ;;  %s185_s2 = inlined_call_operand.vmem [shape: f32[8,128], index: 2, kind: output, shape index: {}]  }
   0x1   :  { %v80_v0 = vld [vmem:[%s183_s0] sm:$0xff]  ;;  %v81_v1 = vld [vmem:[%s183_s0 + $0x8] sm:$0xff] }
   0x2   :  { %145 = vlog2.f32 %v80_v0  ;;  %v90_v2 = vsub.f32 0.0, %v80_v0  ;;  %v91_v3 = vsub.f32 0.0, %v81_v1  ;;  %v82_v27 = vld [vmem:[%s184_s1] sm:$0xff]  ;;  %v83_v29 = vld [vmem:[%s184_s1 + $0x8] sm:$0xff] }
   0x3   :  { %147 = vlog2.f32 %v81_v1 }
   0x4   :  { %v92_v4 = vadd.f32 1.0, %v90_v2  ;;  %v101_v5 = vadd.f32 1.0, %v91_v3  ;;  %v95_v6 = vmul.f32 -0.5, %v90_v2  ;;  %v104_v7 = vmul.f32 -0.5, %v91_v3 }
   0x5   :  { %v98_v10 = vand.u32 2147483647, %v90_v2  ;;  %v107_v13 = vand.u32 2147483647, %v91_v3 }
   0x6   :  { %149 = vlog2.f32 %v92_v4  ;;  %v96_v8 = vadd.f32 1.0, %v95_v6  ;;  %v105_v11 = vadd.f32 1.0, %v104_v7 }
   0x7   :  { %151 = vlog2.f32 %v101_v5  ;;  %vm99_vm0 = vcmp.lt.f32.partialorder %v98_v10, 0.0004427343  ;;  %vm108_vm1 = vcmp.lt.f32.partialorder %v107_v13, 0.0004427343 }
   0x8   :  { %v97_v16 = vmul.f32 %v96_v8, %v90_v2  ;;  %v106_v18 = vmul.f32 %v105_v11, %v91_v3 }
   0xc   :  { %v146_v9 = vpop.eup %145 }
   0xd   :  { %v148_v12 = vpop.eup %147  ;;  %v85_v14 = vmul.f32 0.6931472, %v146_v9 }
   0xe   :  { %v87_v15 = vmul.f32 0.6931472, %v148_v12 }
   0xf   :  { %v88_v21 = vmax.f32 %v85_v14, -100.0 }
  0x10   :  { %v150_v17 = vpop.eup %149  ;;  %v89_v23 = vmax.f32 %v87_v15, -100.0 }
  0x11   :  { %v152_v19 = vpop.eup %151  ;;  %v94_v20 = vmul.f32 0.6931472, %v150_v17 }
  0x12   :  { %v103_v22 = vmul.f32 0.6931472, %v152_v19 }
  0x13   :  { %v100_v24 = vsel %vm99_vm0, %v97_v16, %v94_v20 }
  0x14   :  { %v109_v25 = vsel %vm108_vm1, %v106_v18, %v103_v22  ;;  %v110_v26 = vmax.f32 %v100_v24, -100.0 }
  0x15   :  { %v111_v28 = vmax.f32 %v109_v25, -100.0 }
  0x16   :  { %v112_v30 = vsub.f32 %v88_v21, %v110_v26 }
  0x17   :  { %v113_v31 = vsub.f32 %v89_v23, %v111_v28 }
  0x18   :  { %v114_v32 = vmul.f32 %v112_v30, %v82_v27 }
  0x19   :  { %v115_v33 = vmul.f32 %v113_v31, %v83_v29 }
  0x1a   :  { %v116_v34 = vadd.f32 %v114_v32, %v110_v26 }
  0x1b   :  { %v117_v35 = vadd.f32 %v115_v33, %v111_v28 }
  0x1c   :  { %v118_v36 = vsub.f32 0.0, %v116_v34 }
  0x1d   :  { %v119_v37 = vsub.f32 0.0, %v117_v35 }
  0x1f   :  { %v121_v38 = vadd.f32 %v119_v37, %v118_v36 }
  0x21   :  { %128 = vst [vmem:[%s185_s2] sm:$0xff] %v121_v38 }

</bundles_post_ra>
